<compile_context>
chip_gen: v7x
topology: tpu7x:2x2x1
jax: 0.10.0
libtpu: 0.0.40
codegen_flags: <defaults>
</compile_context>

<pallas_src>
import jax
import jax.numpy as jnp
from jax.experimental import pallas as pl
from jax.experimental.pallas import tpu as pltpu

_LANE = 128                              # vreg lane width; keep output lane-dense
_TARGET_BLOCK_BYTES = 2 * 1024 * 1024    # ~2 MiB/block


def _round_up(a: int, b: int) -> int:
    return ((a + b - 1) // b) * b


def _round_down(a: int, b: int) -> int:
    return (a // b) * b


def _sublane_granule(dtype) -> int:
    # 8 rows for 32-bit, 16 for 16-bit, 32 for 8-bit (sub-32-bit packs sublanes).
    return max(8, 32 // jnp.dtype(dtype).itemsize)


def _squared_relu_kernel(x_ref, o_ref):
    x = x_ref[...]
    y = jnp.maximum(x, 0)
    o_ref[...] = y * y


def _run_2d(x2d):
    rows, lanes = x2d.shape
    dtype = x2d.dtype
    itemsize = jnp.dtype(dtype).itemsize
    granule = _sublane_granule(dtype)

    # ~2 MiB block cap, rounded to the sublane granule.
    cap = max(granule, _round_down(_TARGET_BLOCK_BYTES // (lanes * itemsize), granule))

    if rows <= 2 * granule:
        # Tiny input: one full-extent block (full array dims are always legal).
        block_rows = rows
    else:
        # At least 2 grid steps (lets the parallel row axis shard across the
        # two TensorCores on v7x), capped at ~2 MiB blocks.  The ragged
        # boundary block, if any, is clipped by Pallas.
        block_rows = max(granule, min(cap, _round_up(pl.cdiv(rows, 2), granule)))

    grid = pl.cdiv(rows, block_rows)

    return pl.pallas_call(
        _squared_relu_kernel,
        out_shape=jax.ShapeDtypeStruct((rows, lanes), dtype),
        grid=(grid,),
        in_specs=[pl.BlockSpec((block_rows, lanes), lambda i: (i, 0))],
        out_specs=pl.BlockSpec((block_rows, lanes), lambda i: (i, 0)),
        compiler_params=pltpu.CompilerParams(
            dimension_semantics=("parallel",)),
    )(x2d)


def squared_relu(x):
    """Elementwise relu(x)**2 via a tiled, pipelined Pallas TPU kernel."""
    orig_shape = x.shape
    n = x.size
    if n == 0:
        return x

    if n % _LANE == 0:
        # Common case: free reshape to a lane-dense [rows, 128] slab.
        out2d = _run_2d(x.reshape(-1, _LANE))
        return out2d.reshape(orig_shape)

    # Rare ragged case: pad the flat tail to a lane multiple (relu(0)**2 == 0;
    # padded elements are sliced off afterwards).
    rows = pl.cdiv(n, _LANE)
    padded = rows * _LANE
    flat = jnp.pad(jnp.ravel(x), (0, padded - n))
    out2d = _run_2d(flat.reshape(rows, _LANE))
    return out2d.reshape(-1)[:n].reshape(orig_shape)


if __name__ == "__main__":
    key = jax.random.PRNGKey(0)
    k0, k1, k2, k3 = jax.random.split(key, 4)

    # Small shape implied by the module's typical use (seq=8, batch=2, hidden=32):
    # n % 128 == 0 -> zero-copy path, single block.
    x = jax.random.normal(k0, (8, 2, 32), jnp.float32)
    out = jax.block_until_ready(squared_relu(x))
    ref = jnp.square(jnp.maximum(x, 0.0))
    assert out.shape == x.shape
    assert jnp.allclose(out, ref, atol=1e-6, rtol=1e-6)

    # Medium f32 shape: multi-step row grid, no padding.
    xb = jax.random.normal(k1, (64, 4, 256), jnp.float32)
    outb = jax.block_until_ready(squared_relu(xb))
    refb = jnp.square(jnp.maximum(xb, 0.0))
    assert outb.shape == xb.shape
    assert jnp.allclose(outb, refb, atol=1e-6, rtol=1e-6)

    # bf16 path: exercises the 16-row sublane granule.
    xc = jax.random.normal(k2, (4, 8, 512), jnp.bfloat16)
    outc = jax.block_until_ready(squared_relu(xc))
    refc = jnp.square(jnp.maximum(xc, jnp.bfloat16(0)))
    assert outc.shape == xc.shape
    assert jnp.allclose(outc.astype(jnp.float32), refc.astype(jnp.float32),
                        atol=1e-2, rtol=1e-2)

    # Ragged case (n % 128 != 0): rare padded path.
    xd = jax.random.normal(k3, (7, 3, 5), jnp.float32)
    outd = jax.block_until_ready(squared_relu(xd))
    refd = jnp.square(jnp.maximum(xd, 0.0))
    assert outd.shape == xd.shape
    assert jnp.allclose(outd, refd, atol=1e-6, rtol=1e-6)

    print("KERNEL_OK")
</pallas_src>

<mosaic_0001>
module attributes {stable_mosaic.version = 11 : i64} {
  func.func @_squared_relu_kernel(%arg0: i32, %arg1: memref<4x128xf32, #tpu.memory_space<vmem>>, %arg2: memref<4x128xf32, #tpu.memory_space<vmem>>) attributes {dimension_semantics = [#tpu.dimension_semantics<parallel>], iteration_bounds = array<i64: 1>, scalar_prefetch = 0 : i64, scratch_operands = 0 : i64, tpu.core_type = #tpu.core_type<tc>, window_params = [{transform_indices = @transform_0, window_bounds = array<i64: 4, 128>}, {transform_indices = @transform_1, window_bounds = array<i64: 4, 128>}]} {
    %c0 = arith.constant 0 : index
    %c0_0 = arith.constant 0 : index
    %0 = vector.load %arg1[%c0, %c0_0] : memref<4x128xf32, #tpu.memory_space<vmem>>, vector<4x128xf32>
    %cst = arith.constant 0.000000e+00 : f32
    %1 = vector.broadcast %cst : f32 to vector<4x128xf32>
    %2 = arith.maximumf %0, %1 : vector<4x128xf32>
    %3 = arith.mulf %2, %2 : vector<4x128xf32>
    %c0_1 = arith.constant 0 : index
    %c0_2 = arith.constant 0 : index
    %4 = vector.load %arg2[%c0_1, %c0_2] : memref<4x128xf32, #tpu.memory_space<vmem>>, vector<4x128xf32>
    tpu.vector_store %arg2[%c0_1, %c0_2], %3 {strides = array<i32>} : memref<4x128xf32, #tpu.memory_space<vmem>>, vector<4x128xf32>,
    return
  }
  func.func @transform_0(%arg0: i32) -> (i32, i32) {
    %c0_i32 = arith.constant 0 : i32
    %c0_i32_0 = arith.constant 0 : i32
    return %arg0, %c0_i32 : i32, i32
  }
  func.func @transform_1(%arg0: i32) -> (i32, i32) {
    %c0_i32 = arith.constant 0 : i32
    %c0_i32_0 = arith.constant 0 : i32
    return %arg0, %c0_i32 : i32, i32
  }
}

</mosaic_0001>

<bundles_post_ra>
// kernel: tpu_custom_call.1
= control target key start
LH: loop header
LB: loop body
LE: loop exit
PB: predicated region body
PF: predicated region fallthrough
CT: control target
= control target key end

     0   :  { %6 = vsyncpa [#allocation3], 0  ;;  %s126_s0 = inlined_call_operand.hbm [shape: f32[4,128], index: 0, kind: input, shape index: {}]   ;;  %s127_s1 = inlined_call_operand.hbm [shape: f32[4,128], index: 1, kind: output, shape index: {}]  }
   0x1   :  { %7 = vsyncpa [#allocation4], 0  ;;  %s90_s6 = smov [#allocation2]   ;;  %s42_s10 = scalar_lea.hbm %s126_s0, 64 }
   0x2   :  { %s14_s7 = sshll.u32 %s90_s6, 4  ;;  %p43_p0 = scmp.ne.s32.totalorder %s126_s0, %s42_s10  ;;  %s15_s7 = int_to_ptr.vmem [resolvable:$true] %s14_s7 }
   0x3   :  { %p46_p1 = scmp.lt.u32.totalorder %s42_s10, %s126_s0 }
   0x5   :  { %p48_p2 = pnand %p46_p1, %p43_p0 }
   0x7   :  { %51 = shalt.err (!%p48_p2)
}
   0x8   :  { %s52_s15 = scalar_lea.vmem %s15_s7, 64  ;;  %p57_p4 = scmp.lt.s32.totalorder %s15_s7, %s15_s7 }
   0x9   :  { %p53_p3 = scmp.ne.s32.totalorder %s15_s7, %s52_s15  ;;  %p58_p5 = scmp.lt.s32.totalorder %s52_s15, %s52_s15 }
   0xb   :  { %p59_p6 = por %p58_p5, %p57_p4 }
   0xd   :  { %p60_p7 = pnand %p59_p6, %p53_p3 }
   0xf   :  { %63 = shalt.err (!%p60_p7)
}
  0x10   :  { %17 = dma.hbm_to_vmem [thread:$0]  %s126_s0, 64, %s15_s7, [#allocation3]  }
  0x11   :  { %86 = dma.done.wait [#allocation3], 64  }
  0x12   :  { %87 = vsyncadd [#allocation3], 4294967232  ;;  %v21_v0 = vld [vmem:[#allocation2] sm:$0xf]  ;;  %s91_s18 = smov [#allocation5]  }
  0x13   :  { %s31_s19 = sshll.u32 %s91_s18, 4  ;;  %v22_v1 = vmax.f32 %v21_v0, 0.0  ;;  %s32_s19 = int_to_ptr.vmem [resolvable:$true] %s31_s19 }
  0x14   :  { %s64_s20 = scalar_lea.vmem %s32_s19, 64  ;;  %p69_p9 = scmp.lt.s32.totalorder %s32_s19, %s32_s19 }
  0x15   :  { %v23_v2 = vmul.f32 %v22_v1, %v22_v1  ;;  %p65_p8 = scmp.ne.s32.totalorder %s32_s19, %s64_s20  ;;  %p70_p10 = scmp.lt.s32.totalorder %s64_s20, %s64_s20 }
  0x17   :  { %24 = vst [vmem:[#allocation5] sm:$0xf] %v23_v2  ;;  %p71_p11 = por %p70_p10, %p69_p9 }
  0x19   :  { %p72_p12 = pnand %p71_p11, %p65_p8 }
  0x1b   :  { %75 = shalt.err (!%p72_p12)
}
  0x1c   :  { %s76_s0 = scalar_lea.hbm %s127_s1, 64 }
  0x1d   :  { %p77_p13 = scmp.ne.s32.totalorder %s127_s1, %s76_s0  ;;  %p80_p0 = scmp.lt.u32.totalorder %s76_s0, %s127_s1 }
  0x1f   :  { %p82_p1 = pnand %p80_p0, %p77_p13 }
  0x21   :  { %85 = shalt.err (!%p82_p1)
}
  0x22   :  { %34 = dma.vmem_to_hbm [thread:$0]  %s32_s19, 64, %s127_s1, [#allocation4]  }
  0x23   :  { %88 = dma.done.wait [#allocation4], 64  }
  0x24   :  { %89 = vsyncadd [#allocation4], 4294967232 }
  0x25   :  { %38 = vsyncpa [#allocation3], 1 }
  0x26   :  { %39 = vsyncpa [#allocation4], 1 }

</bundles_post_ra>
